<compile_context>
chip_gen: v5e
topology: v5e:2x2
jax: 0.10.0
libtpu: 0.0.40
codegen_flags: <defaults>
</compile_context>

<pallas_src>
import jax
import jax.numpy as jnp
from jax.experimental import pallas as pl
from jax.experimental.pallas import tpu as pltpu


def _residual_kernel(x_ref, w_ref, b_ref, o_ref):
    # Load the batch tile once; keep everything in vregs (no scratch).
    x = x_ref[...].astype(jnp.float32)
    bias = b_ref[...]                               # (1, H), broadcasts over rows
    h = jnp.dot(x, w_ref[...], preferred_element_type=jnp.float32) + bias
    h = jnp.tanh(h)                                 # EUP
    # Residual connection: x + model(x).
    o_ref[...] = (x + h).astype(o_ref.dtype)        # VPU + single store


def _pick_tile_b(B):
    """Largest batch tile dividing B, preferring grid >= 2 (v7x has 2 TCs)."""
    candidates = (2048, 1024, 512, 256, 128, 64, 32, 16, 8)
    for t in candidates:
        if t <= B and B % t == 0 and B // t >= 2:
            return t
    for t in candidates:
        if t <= B and B % t == 0:
            return t
    return B  # block == full batch dim (always legal per the (8,128) rule)


def residual_model_forward(x, w_t, b, *, tile_b=None):
    """x: (B, H); w_t: (H, H) = W.T; b: (1, H).  Returns x + tanh(x @ W.T + b)."""
    B, H = x.shape
    if tile_b is None:
        tile_b = _pick_tile_b(B)
    assert B % tile_b == 0, (B, tile_b)

    itemsize = jnp.dtype(x.dtype).itemsize
    cost = pl.CostEstimate(
        flops=2 * B * H * H + 2 * B * H,          # matmul + bias + residual add
        transcendentals=B * H,                    # tanh
        bytes_accessed=(B * H + H * H + H + B * H) * itemsize,
    )

    return pl.pallas_call(
        _residual_kernel,
        out_shape=jax.ShapeDtypeStruct((B, H), x.dtype),
        grid_spec=pltpu.PrefetchScalarGridSpec(
            num_scalar_prefetch=0,
            grid=(B // tile_b,),
            in_specs=[
                pl.BlockSpec((tile_b, H), lambda i: (i, 0)),  # x tile (pipelined)
                pl.BlockSpec((H, H), lambda i: (0, 0)),       # W.T (VMEM-resident)
                pl.BlockSpec((1, H), lambda i: (0, 0)),       # bias (VMEM-resident)
            ],
            out_specs=pl.BlockSpec((tile_b, H), lambda i: (i, 0)),
        ),
        compiler_params=pltpu.CompilerParams(
            dimension_semantics=("parallel",),
        ),
        cost_estimate=cost,
    )(x, w_t, b)


def residual_model_reference(x, w_t, b):
    xf = x.astype(jnp.float32)
    return (xf + jnp.tanh(xf @ w_t + b)).astype(x.dtype)


if __name__ == "__main__":
    # Small shapes consistent with the forward: batch=16, hidden=128.
    B, H = 16, 128

    key = jax.random.PRNGKey(0)
    kx, kw, kb = jax.random.split(key, 3)

    x = jax.random.normal(kx, (B, H), dtype=jnp.float32)
    # Deterministic init matching nn.Linear scale ~ U(-1/sqrt(H), 1/sqrt(H)).
    bound = 1.0 / jnp.sqrt(jnp.float32(H))
    w = jax.random.uniform(kw, (H, H), minval=-bound, maxval=bound,
                           dtype=jnp.float32)  # PyTorch layout (out, in)
    b = jax.random.uniform(kb, (H,), minval=-bound, maxval=bound,
                           dtype=jnp.float32)

    # Glue: transpose weight to (in, out), bias to (1, H) for broadcasting.
    w_t = w.T
    b2 = b.reshape(1, H)

    out = residual_model_forward(x, w_t, b2)
    out = jax.block_until_ready(out)

    ref = residual_model_reference(x, w_t, b2)
    assert out.shape == (B, H) and out.dtype == x.dtype
    assert jnp.allclose(out, ref, atol=1e-5, rtol=1e-5), "mismatch vs reference"

    print("KERNEL_OK")
</pallas_src>

<mosaic_0001>
module attributes {stable_mosaic.version = 11 : i64} {
  func.func @_residual_kernel(%arg0: i32, %arg1: memref<8x128xf32, #tpu.memory_space<vmem>>, %arg2: memref<128x128xf32, #tpu.memory_space<vmem>>, %arg3: memref<1x128xf32, #tpu.memory_space<vmem>>, %arg4: memref<8x128xf32, #tpu.memory_space<vmem>>) attributes {dimension_semantics = [#tpu.dimension_semantics<parallel>], iteration_bounds = array<i64: 2>, scalar_prefetch = 0 : i64, scratch_operands = 0 : i64, tpu.core_type = #tpu.core_type<tc>, window_params = [{transform_indices = @transform_0, window_bounds = array<i64: 8, 128>}, {pipeline_mode = #tpu.pipeline_mode<synchronous>, transform_indices = @transform_1, window_bounds = array<i64: 128, 128>}, {pipeline_mode = #tpu.pipeline_mode<synchronous>, transform_indices = @transform_2, window_bounds = array<i64: 1, 128>}, {transform_indices = @transform_3, window_bounds = array<i64: 8, 128>}]} {
    %c0 = arith.constant 0 : index
    %c0_0 = arith.constant 0 : index
    %0 = vector.load %arg1[%c0, %c0_0] : memref<8x128xf32, #tpu.memory_space<vmem>>, vector<8x128xf32>
    %c0_1 = arith.constant 0 : index
    %c0_2 = arith.constant 0 : index
    %1 = vector.load %arg3[%c0_1, %c0_2] : memref<1x128xf32, #tpu.memory_space<vmem>>, vector<1x128xf32>
    %c0_3 = arith.constant 0 : index
    %c0_4 = arith.constant 0 : index
    %2 = vector.load %arg2[%c0_3, %c0_4] : memref<128x128xf32, #tpu.memory_space<vmem>>, vector<128x128xf32>
    %cst = arith.constant dense<0.000000e+00> : vector<8x128xf32>
    %3 = tpu.matmul %0, %2, %cst {dimension_numbers = #tpu.dot_dimension_numbers<[1], [0], [0], [1], [0, 0, 1, 1], [], []>} : vector<8x128xf32>, vector<128x128xf32>, vector<8x128xf32> -> vector<8x128xf32>
    %4 = vector.broadcast %1 : vector<1x128xf32> to vector<8x128xf32>
    %5 = arith.addf %3, %4 : vector<8x128xf32>
    %6 = math.tanh %5 : vector<8x128xf32>
    %7 = arith.addf %0, %6 : vector<8x128xf32>
    %c0_5 = arith.constant 0 : index
    %c0_6 = arith.constant 0 : index
    %8 = vector.load %arg4[%c0_5, %c0_6] : memref<8x128xf32, #tpu.memory_space<vmem>>, vector<8x128xf32>
    tpu.vector_store %arg4[%c0_5, %c0_6], %7 {strides = array<i32>} : memref<8x128xf32, #tpu.memory_space<vmem>>, vector<8x128xf32>,
    return
  }
  func.func @transform_0(%arg0: i32) -> (i32, i32) {
    %c0_i32 = arith.constant 0 : i32
    %c0_i32_0 = arith.constant 0 : i32
    return %arg0, %c0_i32 : i32, i32
  }
  func.func @transform_1(%arg0: i32) -> (i32, i32) {
    %c0_i32 = arith.constant 0 : i32
    %c0_i32_0 = arith.constant 0 : i32
    %c0_i32_1 = arith.constant 0 : i32
    return %c0_i32, %c0_i32_0 : i32, i32
  }
  func.func @transform_2(%arg0: i32) -> (i32, i32) {
    %c0_i32 = arith.constant 0 : i32
    %c0_i32_0 = arith.constant 0 : i32
    %c0_i32_1 = arith.constant 0 : i32
    return %c0_i32, %c0_i32_0 : i32, i32
  }
  func.func @transform_3(%arg0: i32) -> (i32, i32) {
    %c0_i32 = arith.constant 0 : i32
    %c0_i32_0 = arith.constant 0 : i32
    return %arg0, %c0_i32 : i32, i32
  }
}

</mosaic_0001>

<bundles_post_ra>
// kernel: tpu_custom_call.1
= control target key start
LH: loop header
LB: loop body
LE: loop exit
PB: predicated region body
PF: predicated region fallthrough
CT: control target
= control target key end

     0   :  { %8 = vsyncpa [#allocation3], 0  ;;  %s722_s0 = inlined_call_operand.hbm [shape: f32[16,128], index: 0, kind: input, shape index: {}]   ;;  %s723_s1 = inlined_call_operand.hbm [shape: f32[128,128], index: 1, kind: input, shape index: {}]   ;;  %s724_s2 = inlined_call_operand.vmem [shape: f32[1,128], index: 2, kind: input, shape index: {}]   ;;  %s725_s3 = inlined_call_operand.hbm [shape: f32[16,128], index: 3, kind: output, shape index: {}]  }
   0x1   :  { %10 = vsyncpa [#allocation3 + $0x1], 0 }
   0x2   :  { %11 = vsyncpa [#allocation6], 0 }
   0x3   :  { %12 = vsyncpa [#allocation4], 0 }
   0x4   :  { %14 = vsyncpa [#allocation4 + $0x1], 0  ;;  %s576_s12 = smov 0   ;;  %s578_s13 = smov 0  }
   0x5   :  { %s580_s14 = smov 0   ;;  %s582_s15 = smov 0  }
   0x6 LB: > { %s130_s18 = sshll.u32 %s723_s1, 4  ;;  %s600_s19 = sadd.s32 4294967295, %s551_s15   ;;  %s551_s15 = sphi %s582_s15, %s735_s15   ;;  %s547_s14 = sphi %s580_s14, %s734_s14   ;;  %s543_s13 = sphi %s578_s13, %s733_s13   ;;  %s539_s12 = sphi %s576_s12, %s732_s12   ;;  %s131_s18 = int_to_ptr.hbm [resolvable:$true] %s130_s18 }
   0x7   : > { %p346_p0 = scmp.ge.s32.totalorder %s551_s15, 1  ;;  %p41_p1 = scmp.eq.s32.totalorder %s600_s19, 0 }
   0x8   : > { %p119_p2 = scmp.lt.s32.totalorder %s551_s15, 3  ;;  %s553_s21 = smov [#allocation5]  }
   0x9   : > { %s132_s22 = sshll.u32 %s553_s21, 4  ;;  %s554_s23 = smov 128   ;;  %s133_s22 = int_to_ptr.vmem [resolvable:$true] %s132_s22 }
   0xa   : > { %p605_p3 = pnand %p346_p0, %p119_p2  ;;  %s555_s24 = smov 8  }
   0xb   : > { %s345_s25 = sadd.s32 4294967294, %s551_s15   ;;  %s616_s26 = sadd.s32 1, %s551_s15  }
   0xc   : > { %p367_p4 = pneg %p605_p3  ;;  %s27_s27 = sadd.s32 1, %s547_s14 }
   0xd   : > { %s24_s28 = ssub.s32 %s551_s15, %s616_s26  ;;  %p34_p7 = scmp.ne.s32.totalorder %s547_s14, %s543_s13 }
   0xe   : > { %p368_p6 = pnand %p367_p4, %p41_p1  ;;  %p25_p8 = scmp.eq.s32.totalorder %s24_s28, 0 }
   0xf   : > { %p35_p9 = scmp.eq.s32.totalorder %s551_s15, 0  ;;  %p40_p10 = scmp.ne.s32.totalorder %s543_s13, %s539_s12 }
  0x10   : > { %370 = dma.hbm_to_vmem [thread:$0]  (!%p368_p6), %s131_s18, 2048, %s133_s22, [#allocation6], %s554_s23, %s554_s23, %s555_s24  }
  0x11   : > { %p106_p11 = scmp.eq.s32.totalorder %s600_s19, 1  ;;  %p632_p12 = por %p41_p1, %p40_p10 }
  0x12   : > { %s628_s29 = scalar_select %p25_p8, %s547_s14, %s27_s27  }
  0x13   : > { %p636_p13 = por %p106_p11, %p34_p7  ;;  %p112_p0 = scmp.eq.s32.totalorder %s345_s25, 1 }
  0x14   : > { %p36_p2 = por %p35_p9, %p34_p7  ;;  %s149_s5 = sand.u32 1, %s547_s14  }
  0x15   : > { %p641_p4 = por %p112_p0, %p40_p10  ;;  %p380_p6 = scmp.lt.s32.totalorder %s551_s15, 2 }
  0x16   : > { %s349_s7 = sshll.u32 %s149_s5, 3  ;;  %s350_s8 = sshll.u32 %s551_s15, 3 }
  0x17   : > { %s157_s11 = scalar_lea.hbm %s722_s0, %s350_s8  ;;  %s153_s17 = scalar_lea.vmem [#allocation2], %s349_s7 }
  0x18   : > { %s159_s16 = sshll.u32 %s157_s11, 4  ;;  %s161_s18 = sshll.u32 %s153_s17, 4  ;;  %s160_s16 = int_to_ptr.hbm [resolvable:$true] %s159_s16  ;;  %s162_s18 = int_to_ptr.vmem [resolvable:$true] %s161_s18 }
  0x19   : > { %p650_p8 = pnand %p380_p6, %p36_p2  ;;  %s150_s22 = scalar_lea.sflag [#allocation3], %s149_s5 }
  0x1a   : > { %s451_s23 = sshra.s32 %s160_s16, 4  ;;  %s458_s28 = scalar_lea.hbm %s722_s0, 16  ;;  %s452_s23 = int_to_ptr.hbm [resolvable:$true] %s451_s23 }
  0x1b   : > { %s453_s24 = scalar_lea.hbm %s452_s23, 8  ;;  %p455_p9 = pneg %p650_p8 }
  0x1c   : > { %p454_p7 = scmp.ne.s32.totalorder %s452_s23, %s453_s24  ;;  %p459_p0 = scmp.lt.s32.totalorder %s452_s23, %s722_s0 }
  0x1d   : > { %p460_p2 = scmp.lt.s32.totalorder %s458_s28, %s453_s24 }
  0x1e   : > { %p456_p10 = pnand %p455_p9, %p454_p7 }
  0x1f   : > { %p461_p6 = por %p460_p2, %p459_p0 }
  0x20   : > { %p457_p11 = pneg %p456_p10 }
  0x22   : > { %p462_p5 = pnand %p461_p6, %p457_p11 }
  0x24   : > { %465 = shalt.err (!%p462_p5)
}
  0x25   : > { %374 = dma.hbm_to_vmem [thread:$0]  (!%p650_p8), %s160_s16, 128, %s162_s18, %s150_s22  }
  0x26   : > { %170 = sbr.rel (%p605_p3) target bundleno = 218 (0xda), region = 32  ;;  %s667_s5 = sand.u32 (!%p605_p3), 1, %s543_s13  }
  0x27   : > { %s352_s9 = sshll.u32 (!%p605_p3), %s667_s5, 3  ;;  %s173_s10 = scalar_lea.sflag (!%p605_p3), [#allocation3], %s667_s5 }
  0x28   : > { %s673_s11 = scalar_lea.vmem (!%p605_p3), [#allocation2], %s352_s9 }
  0x2b   : > { %526 = dma.done.wait (%p632_p12), %s173_s10, 128  }
  0x2c   : > { %528 = vsyncadd (%p632_p12), %s173_s10, 4294967168 }
  0x2d   : > { %530 = dma.done.wait (%p41_p1), [#allocation6], 2048  }
  0x2e   : > { %532 = vsyncadd (%p41_p1), [#allocation6], 4294965248  ;;  %v222_v0 = vld [vmem:[#allocation5 + $0x78] sm:$0xff]  ;;  %v221_v1 = vld [vmem:[#allocation5 + $0x70] sm:$0xff]  ;;  %s356_s16 = sshll.u32 %s600_s19, 3  ;;  %s204_s22 = scalar_lea.vmem [#allocation7], %s352_s9 }
  0x2f   : > { %226 = vmatpush.msra.mxu0 %v222_v0  ;;  %v220_v2 = vld [vmem:[#allocation5 + $0x68] sm:$0xff]  ;;  %v219_v3 = vld [vmem:[#allocation5 + $0x60] sm:$0xff]  ;;  %v218_v4 = vld [vmem:[#allocation5 + $0x58] sm:$0xff]  ;;  %s260_s21 = scalar_lea.hbm %s725_s3, %s356_s16  ;;  %s262_s23 = sshll.u32 %s204_s22, 4  ;;  %s263_s23 = int_to_ptr.vmem [resolvable:$true] %s262_s23 }
  0x30   : > { %v217_v5 = vld [vmem:[#allocation5 + $0x50] sm:$0xff]  ;;  %v216_v6 = vld [vmem:[#allocation5 + $0x48] sm:$0xff]  ;;  %v215_v7 = vld [vmem:[#allocation5 + $0x40] sm:$0xff]  ;;  %s264_s24 = sshll.u32 %s260_s21, 4  ;;  %s250_s25 = scalar_lea.sflag [#allocation4], %s667_s5  ;;  %s265_s24 = int_to_ptr.hbm [resolvable:$true] %s264_s24 }
  0x31   : > { %227 = vmatpush.msra.mxu0 %v221_v1  ;;  %v214_v8 = vld [vmem:[#allocation5 + $0x38] sm:$0xff]  ;;  %v213_v9 = vld [vmem:[#allocation5 + $0x30] sm:$0xff]  ;;  %v212_v10 = vld [vmem:[#allocation5 + $0x28] sm:$0xff]  ;;  %s495_s27 = sshra.s32 %s265_s24, 4  ;;  %s501_s8 = scalar_lea.hbm %s725_s3, 16  ;;  %s496_s27 = int_to_ptr.hbm [resolvable:$true] %s495_s27 }
  0x32   : > { %v211_v11 = vld [vmem:[#allocation5 + $0x20] sm:$0xff]  ;;  %v210_v12 = vld [vmem:[#allocation5 + $0x18] sm:$0xff]  ;;  %v209_v13 = vld [vmem:[#allocation5 + $0x10] sm:$0xff]  ;;  %s497_s28 = scalar_lea.hbm %s496_s27, 8  ;;  %p502_p12 = scmp.lt.s32.totalorder %s496_s27, %s725_s3 }
  0x33   : > { %228 = vmatpush.msra.mxu0 %v220_v2  ;;  %v208_v14 = vld [vmem:[#allocation5 + $0x8] sm:$0xff]  ;;  %v207_v15 = vld [vmem:[#allocation5] sm:$0xff]  ;;  %v205_v16 = vld [vmem:[%s673_s11] sm:$0xff]  ;;  %p498_p1 = scmp.ne.s32.totalorder %s496_s27, %s497_s28  ;;  %p503_p8 = scmp.lt.s32.totalorder %s501_s8, %s497_s28 }
  0x34   : > { %v418_v17 = vld [vmem:[%s724_s2] ss:$0 sm:$0xff] }
  0x35   : > { %229 = vmatpush.msra.mxu0 %v219_v3  ;;  %p499_p3 = pnand %p498_p1, %p636_p13  ;;  %p504_p7 = por %p503_p8, %p502_p12 }
  0x37   : > { %230 = vmatpush.msra.mxu0 %v218_v4  ;;  %p500_p5 = pneg %p499_p3 }
  0x39   : > { %231 = vmatpush.msra.mxu0 %v217_v5  ;;  %p505_p9 = pnand %p504_p7, %p500_p5 }
  0x3b   : > { %232 = vmatpush.msra.mxu0 %v216_v6 }
  0x3d   : > { %233 = vmatpush.msra.mxu0 %v215_v7 }
  0x3f   : > { %234 = vmatpush.msra.mxu0 %v214_v8 }
  0x41   : > { %235 = vmatpush.msra.mxu0 %v213_v9 }
  0x43   : > { %236 = vmatpush.msra.mxu0 %v212_v10 }
  0x45   : > { %237 = vmatpush.msra.mxu0 %v211_v11 }
  0x47   : > { %238 = vmatpush.msra.mxu0 %v210_v12 }
  0x49   : > { %239 = vmatpush.msra.mxu0 %v209_v13 }
  0x4b   : > { %240 = vmatpush.msra.mxu0 %v208_v14 }
  0x4d   : > { %241 = vmatpush.msra.mxu0 %v207_v15 }
  0x4e   : > { %242 = vmatmul.f32.vlgmr.msra.gmra.mxu0 %v205_v16 }
  0xcb   : > { %v243_v18 = vpop.f32.mrf.mxu0 }
  0xcc   : > { %v244_v19 = vadd.f32 %v418_v17, %v243_v18 }
  0xce   : > { %419 = vtanh.f32 %v244_v19 }
  0xd4   : > { %v420_v20 = vpop.eup %419 }
  0xd5   : > { %v247_v21 = vadd.f32 %v420_v20, %v205_v16 }
  0xd7   : > { %248 = vst [vmem:[%s204_s22] sm:$0xff] %v247_v21 }
  0xd8   : > { %508 = shalt.err (!%p505_p9)
}
  0xd9   : > { %365 = dma.vmem_to_hbm [thread:$0]  (%p636_p13), %s263_s23, 128, %s265_s24, %s250_s25  }
  0xda PF: > { %s276_s5 = sand.u32 1, %s539_s12   ;;  %p731_p10 = scmp.ge.s32.totalorder %s551_s15, 2 }
  0xdb   : > { %s277_s11 = scalar_lea.sflag [#allocation4], %s276_s5 }
  0xdc   : > { %p376_p11 = pnand %p731_p10, %p641_p4 }
  0xde   : > { %p377_p0 = pneg %p376_p11 }
  0xe0   : > { %534 = dma.done.wait (%p377_p0), %s277_s11, 128  }
  0xe1   : > { %536 = vsyncadd (%p377_p0), %s277_s11, 4294967168  ;;  %p17_p2 = scmp.ge.s32.totalorder %s616_s26, 4   ;;  %s732_s12 = smov %s543_s13 }
  0xe2   : > { %s733_s13 = smov %s547_s14  ;;  %s734_s14 = smov %s628_s29 }
  0xe3   : > { %s735_s15 = smov %s616_s26  ;;  %19 = sbr.rel (!%p17_p2) target bundleno = 6 (0x6), region = 81 }
  0xe8   :  { %283 = vsyncpa [#allocation3], 1 }
  0xe9   :  { %285 = vsyncpa [#allocation3 + $0x1], 1 }
  0xea   :  { %286 = vsyncpa [#allocation6], 1 }
  0xeb   :  { %287 = vsyncpa [#allocation4], 1 }
  0xec   :  { %289 = vsyncpa [#allocation4 + $0x1], 1 }

</bundles_post_ra>
